<compile_context>
chip_gen: v6e
topology: v6e:2x2x1
jax: 0.10.0
libtpu: 0.0.40
codegen_flags: <defaults>
</compile_context>

<pallas_src>
import numpy as np
import jax
import jax.numpy as jnp
from jax.experimental import pallas as pl
from jax.experimental.pallas import tpu as pltpu


def encoder_kernel(ids_ref, tab_ref, whh_ref, hc_ref, gx_scr):
    """Fused embedding + input projection + LSTM recurrence, single invocation.

    ids_ref : (S*B_pad, 1) int32  token ids (time-major, padded batch)
    tab_ref : (V, 4H)      f32    fused table: emb @ W_ih^T + (b_ih + b_hh)
    whh_ref : (H, 4H)      f32    hidden-hidden weights (pre-transposed)
    hc_ref  : (B_pad, W)   f32    output slab, W = round_up(2H, 128): [h | c | 0pad]
    gx_scr  : (S*B_pad, 4H) f32   VMEM scratch for the hoisted projection
    """
    SB = ids_ref.shape[0]
    V = tab_ref.shape[0]
    H = whh_ref.shape[0]
    G = 4 * H
    B_pad = hc_ref.shape[0]
    S = SB // B_pad

    # 1) Embedding lookup AND input-hidden projection in one exact MXU pass:
    #    one-hot rows are 0/1, so onehot @ (emb @ W_ih^T + b) == x_t @ W_ih^T + b.
    ids = ids_ref[...]                                           # (SB, 1)
    iota_v = jax.lax.broadcasted_iota(jnp.int32, (SB, V), 1)     # (SB, V)
    onehot = (ids == iota_v).astype(jnp.float32)                 # (SB, V)
    gx_scr[...] = jnp.dot(onehot, tab_ref[...],
                          preferred_element_type=jnp.float32)    # (SB, 4H)

    whh = whh_ref[...]                                           # (H, 4H)

    # Hoisted lane mask marking the g (cell-candidate) gate columns [2H, 3H).
    lane = jax.lax.broadcasted_iota(jnp.int32, (B_pad, G), 1)
    g_cols = (lane >= 2 * H) & (lane < 3 * H)

    # 2) Recurrence: per step only the hidden-hidden matmul + gate math.
    def step(t, carry):
        h, c = carry
        i0 = pl.multiple_of(t * B_pad, B_pad)
        gates = gx_scr[pl.ds(i0, B_pad), :] + jnp.dot(
            h, whh, preferred_element_type=jnp.float32)          # (B_pad, 4H)
        # Full-width transcendentals (one sigmoid + one tanh over the whole
        # 4H-lane slab) instead of four 32-lane sub-vreg slices.
        act = jnp.where(g_cols, jnp.tanh(gates), jax.nn.sigmoid(gates))
        i_g = act[:, 0 * H:1 * H]
        f_g = act[:, 1 * H:2 * H]
        g_g = act[:, 2 * H:3 * H]
        o_g = act[:, 3 * H:4 * H]
        c_new = f_g * c + i_g * g_g
        h_new = o_g * jnp.tanh(c_new)
        return (h_new, c_new)

    h0 = jnp.zeros((B_pad, H), jnp.float32)
    c0 = jnp.zeros((B_pad, H), jnp.float32)
    unroll = True if S <= 16 else 8
    h, c = jax.lax.fori_loop(0, S, step, (h0, c0), unroll=unroll)

    # 3) Single full-width, lane-dense store of the packed final state.
    pad = hc_ref.shape[1] - 2 * H
    pieces = [h, c]
    if pad:
        pieces.append(jnp.zeros((B_pad, pad), jnp.float32))
    hc_ref[...] = jnp.concatenate(pieces, axis=1)


def encoder_forward(input_seq, params):
    """input_seq: (S, B) int32 tokens.  Returns (hidden, cell), each (1, B, H)."""
    emb_table = params["embedding"]            # (V, E)
    w_ih = params["w_ih"]                      # (4H, E)
    w_hh = params["w_hh"]                      # (4H, H)
    bias = params["b_ih"] + params["b_hh"]     # (4H,)

    S, B = input_seq.shape
    V = emb_table.shape[0]
    H = w_hh.shape[1]
    B_pad = ((B + 7) // 8) * 8                 # pad batch to sublane width
    HC_W = max(((2 * H + 127) // 128) * 128, 128)   # lane-dense output slab

    # One-time wrapper glue: fuse embedding + bias into the input projection,
    # pad batch with token 0 (sliced off below), transpose W_hh.
    fused_tab = emb_table @ w_ih.T + bias[None, :]          # (V, 4H)
    w_hh_t = w_hh.T                                          # (H, 4H)
    ids = jnp.pad(input_seq.astype(jnp.int32), ((0, 0), (0, B_pad - B)))
    ids2d = ids.reshape(S * B_pad, 1)
    # NOTE: out-of-range token ids would silently produce a zero embedding row
    # (all-zero one-hot) rather than erroring like nn.Embedding.

    # Explicit VMEM budget sized from the actual residents (+ headroom),
    # instead of relying on the 16/32 MiB default scoped limit.
    resident_bytes = 4 * (S * B_pad * 128          # ids, lane-padded tile
                          + V * 4 * H              # fused table
                          + H * 4 * H              # W_hh
                          + B_pad * HC_W           # output slab
                          + S * B_pad * 4 * H)     # gx scratch
    vmem_limit = int(min(max(3 * resident_bytes + (8 << 20), 32 << 20),
                         100 << 20))

    vmem_spec = pl.BlockSpec(memory_space=pltpu.MemorySpace.VMEM)
    hc = pl.pallas_call(
        encoder_kernel,
        out_shape=jax.ShapeDtypeStruct((B_pad, HC_W), jnp.float32),
        in_specs=[vmem_spec, vmem_spec, vmem_spec],
        out_specs=vmem_spec,
        scratch_shapes=[pltpu.VMEM((S * B_pad, 4 * H), jnp.float32)],
        compiler_params=pltpu.CompilerParams(vmem_limit_bytes=vmem_limit),
    )(ids2d, fused_tab, w_hh_t)

    hidden = hc[:B, 0:H][None]                 # (1, B, H)
    cell = hc[:B, H:2 * H][None]               # (1, B, H)
    return hidden, cell


def encoder_reference(input_seq, params):
    """Pure-JAX reference matching PyTorch nn.Embedding + nn.LSTM semantics."""
    emb_table = params["embedding"]
    w_ih, w_hh = params["w_ih"], params["w_hh"]
    bias = params["b_ih"] + params["b_hh"]
    H = w_hh.shape[1]
    embedded = jnp.take(emb_table, input_seq, axis=0)   # (S, B, E)
    B = embedded.shape[1]

    def step(carry, x_t):
        h, c = carry
        gates = x_t @ w_ih.T + h @ w_hh.T + bias
        i = jax.nn.sigmoid(gates[:, 0 * H:1 * H])
        f = jax.nn.sigmoid(gates[:, 1 * H:2 * H])
        g = jnp.tanh(gates[:, 2 * H:3 * H])
        o = jax.nn.sigmoid(gates[:, 3 * H:4 * H])
        c_new = f * c + i * g
        h_new = o * jnp.tanh(c_new)
        return (h_new, c_new), None

    h0 = jnp.zeros((B, H), jnp.float32)
    c0 = jnp.zeros((B, H), jnp.float32)
    (h, c), _ = jax.lax.scan(step, (h0, c0), embedded)
    return h[None], c[None]


def init_params(key, input_dim, emb_dim, hidden_dim):
    k1, k2, k3, k4, k5 = jax.random.split(key, 5)
    bound = 1.0 / np.sqrt(hidden_dim)
    return {
        # nn.Embedding: N(0, 1)
        "embedding": jax.random.normal(k1, (input_dim, emb_dim), jnp.float32),
        # nn.LSTM: U(-1/sqrt(H), 1/sqrt(H)), gate order i,f,g,o
        "w_ih": jax.random.uniform(k2, (4 * hidden_dim, emb_dim),
                                   jnp.float32, -bound, bound),
        "w_hh": jax.random.uniform(k3, (4 * hidden_dim, hidden_dim),
                                   jnp.float32, -bound, bound),
        "b_ih": jax.random.uniform(k4, (4 * hidden_dim,),
                                   jnp.float32, -bound, bound),
        "b_hh": jax.random.uniform(k5, (4 * hidden_dim,),
                                   jnp.float32, -bound, bound),
    }


if __name__ == "__main__":
    INPUT_DIM = 16     # vocab size
    EMB_DIM = 32
    HIDDEN_DIM = 32
    SEQ_LEN = 8
    BATCH = 4

    key = jax.random.PRNGKey(0)
    pkey, dkey = jax.random.split(key)
    params = init_params(pkey, INPUT_DIM, EMB_DIM, HIDDEN_DIM)
    input_seq = jax.random.randint(dkey, (SEQ_LEN, BATCH), 0, INPUT_DIM,
                                   dtype=jnp.int32)

    hidden, cell = jax.jit(encoder_forward)(input_seq, params)
    jax.block_until_ready((hidden, cell))

    h_ref, c_ref = encoder_reference(input_seq, params)
    assert hidden.shape == (1, BATCH, HIDDEN_DIM)
    assert cell.shape == (1, BATCH, HIDDEN_DIM)
    np.testing.assert_allclose(np.asarray(hidden), np.asarray(h_ref),
                               rtol=1e-5, atol=1e-5)
    np.testing.assert_allclose(np.asarray(cell), np.asarray(c_ref),
                               rtol=1e-5, atol=1e-5)

    print("KERNEL_OK")
</pallas_src>

<mosaic_0001>
module attributes {stable_mosaic.version = 11 : i64} {
  func.func @encoder_kernel(%arg0: memref<64x1xi32, #tpu.memory_space<vmem>>, %arg1: memref<16x128xf32, #tpu.memory_space<vmem>>, %arg2: memref<32x128xf32, #tpu.memory_space<vmem>>, %arg3: memref<8x128xf32, #tpu.memory_space<vmem>>, %arg4: memref<64x128xf32, #tpu.memory_space<vmem>>) attributes {dimension_semantics = [], scalar_prefetch = 0 : i64, scratch_operands = 1 : i64, tpu.core_type = #tpu.core_type<tc>} {
    %c0 = arith.constant 0 : index
    %c0_0 = arith.constant 0 : index
    %0 = vector.load %arg0[%c0, %c0_0] : memref<64x1xi32, #tpu.memory_space<vmem>>, vector<64x1xi32>
    %1 = tpu.iota {dimensions = array<i32: 1>} : vector<64x16xi32>
    %2 = vector.broadcast %0 : vector<64x1xi32> to vector<64x16xi32>
    %3 = arith.cmpi eq, %2, %1 : vector<64x16xi32>
    %4 = arith.extui %3 : vector<64x16xi1> to vector<64x16xi32>
    %5 = arith.sitofp %4 : vector<64x16xi32> to vector<64x16xf32>
    %c0_1 = arith.constant 0 : index
    %c0_2 = arith.constant 0 : index
    %6 = vector.load %arg1[%c0_1, %c0_2] : memref<16x128xf32, #tpu.memory_space<vmem>>, vector<16x128xf32>
    %cst = arith.constant dense<0.000000e+00> : vector<64x128xf32>
    %7 = tpu.matmul %5, %6, %cst {dimension_numbers = #tpu.dot_dimension_numbers<[1], [0], [0], [1], [0, 0, 1, 1], [], []>} : vector<64x16xf32>, vector<16x128xf32>, vector<64x128xf32> -> vector<64x128xf32>
    %c0_3 = arith.constant 0 : index
    %c0_4 = arith.constant 0 : index
    %8 = vector.load %arg4[%c0_3, %c0_4] : memref<64x128xf32, #tpu.memory_space<vmem>>, vector<64x128xf32>
    tpu.vector_store %arg4[%c0_3, %c0_4], %7 {strides = array<i32>} : memref<64x128xf32, #tpu.memory_space<vmem>>, vector<64x128xf32>,
    %c0_5 = arith.constant 0 : index
    %c0_6 = arith.constant 0 : index
    %9 = vector.load %arg2[%c0_5, %c0_6] : memref<32x128xf32, #tpu.memory_space<vmem>>, vector<32x128xf32>
    %10 = tpu.iota {dimensions = array<i32: 1>} : vector<8x128xi32>
    %c64_i32 = arith.constant 64 : i32
    %11 = vector.broadcast %c64_i32 : i32 to vector<8x128xi32>
    %12 = arith.cmpi sge, %10, %11 : vector<8x128xi32>
    %c96_i32 = arith.constant 96 : i32
    %13 = vector.broadcast %c96_i32 : i32 to vector<8x128xi32>
    %14 = arith.cmpi slt, %10, %13 : vector<8x128xi32>
    %15 = arith.andi %12, %14 : vector<8x128xi1>
    %cst_7 = arith.constant 0.000000e+00 : f32
    %16 = vector.broadcast %cst_7 : f32 to vector<8x32xf32>
    %cst_8 = arith.constant 0.000000e+00 : f32
    %17 = vector.broadcast %cst_8 : f32 to vector<8x32xf32>
    %c0_i32 = arith.constant 0 : i32
    %c8_i32 = arith.constant 8 : i32
    %18 = arith.muli %c0_i32, %c8_i32 : i32
    %19 = tpu.assume_multiple %18, 8 : i32
    %20 = arith.index_cast %19 : i32 to index
    %c0_9 = arith.constant 0 : index
    %21 = vector.load %arg4[%20, %c0_9] : memref<64x128xf32, #tpu.memory_space<vmem>>, vector<8x128xf32>
    %cst_10 = arith.constant dense<0.000000e+00> : vector<8x128xf32>
    %22 = tpu.matmul %16, %9, %cst_10 {dimension_numbers = #tpu.dot_dimension_numbers<[1], [0], [0], [1], [0, 0, 1, 1], [], []>} : vector<8x32xf32>, vector<32x128xf32>, vector<8x128xf32> -> vector<8x128xf32>
    %23 = arith.addf %21, %22 : vector<8x128xf32>
    %24 = math.tanh %23 : vector<8x128xf32>
    %25 = arith.negf %23 : vector<8x128xf32>
    %26 = math.exp %25 : vector<8x128xf32>
    %cst_11 = arith.constant 1.000000e+00 : f32
    %27 = vector.broadcast %cst_11 : f32 to vector<8x128xf32>
    %28 = arith.addf %27, %26 : vector<8x128xf32>
    %29 = arith.divf %27, %28 : vector<8x128xf32>
    %30 = arith.select %15, %24, %29 : vector<8x128xi1>, vector<8x128xf32>
    %31 = vector.extract_strided_slice %30 {offsets = [0, 0], sizes = [8, 32], strides = [1, 1]} : vector<8x128xf32> to vector<8x32xf32>
    %32 = vector.extract_strided_slice %30 {offsets = [0, 32], sizes = [8, 32], strides = [1, 1]} : vector<8x128xf32> to vector<8x32xf32>
    %33 = vector.extract_strided_slice %30 {offsets = [0, 64], sizes = [8, 32], strides = [1, 1]} : vector<8x128xf32> to vector<8x32xf32>
    %34 = vector.extract_strided_slice %30 {offsets = [0, 96], sizes = [8, 32], strides = [1, 1]} : vector<8x128xf32> to vector<8x32xf32>
    %35 = arith.mulf %32, %17 : vector<8x32xf32>
    %36 = arith.mulf %31, %33 : vector<8x32xf32>
    %37 = arith.addf %35, %36 : vector<8x32xf32>
    %38 = math.tanh %37 : vector<8x32xf32>
    %39 = arith.mulf %34, %38 : vector<8x32xf32>
    %c1_i32 = arith.constant 1 : i32
    %c8_i32_12 = arith.constant 8 : i32
    %40 = arith.muli %c1_i32, %c8_i32_12 : i32
    %41 = tpu.assume_multiple %40, 8 : i32
    %42 = arith.index_cast %41 : i32 to index
    %c0_13 = arith.constant 0 : index
    %43 = vector.load %arg4[%42, %c0_13] : memref<64x128xf32, #tpu.memory_space<vmem>>, vector<8x128xf32>
    %cst_14 = arith.constant dense<0.000000e+00> : vector<8x128xf32>
    %44 = tpu.matmul %39, %9, %cst_14 {dimension_numbers = #tpu.dot_dimension_numbers<[1], [0], [0], [1], [0, 0, 1, 1], [], []>} : vector<8x32xf32>, vector<32x128xf32>, vector<8x128xf32> -> vector<8x128xf32>
    %45 = arith.addf %43, %44 : vector<8x128xf32>
    %46 = math.tanh %45 : vector<8x128xf32>
    %47 = arith.negf %45 : vector<8x128xf32>
    %48 = math.exp %47 : vector<8x128xf32>
    %cst_15 = arith.constant 1.000000e+00 : f32
    %49 = vector.broadcast %cst_15 : f32 to vector<8x128xf32>
    %50 = arith.addf %49, %48 : vector<8x128xf32>
    %51 = arith.divf %49, %50 : vector<8x128xf32>
    %52 = arith.select %15, %46, %51 : vector<8x128xi1>, vector<8x128xf32>
    %53 = vector.extract_strided_slice %52 {offsets = [0, 0], sizes = [8, 32], strides = [1, 1]} : vector<8x128xf32> to vector<8x32xf32>
    %54 = vector.extract_strided_slice %52 {offsets = [0, 32], sizes = [8, 32], strides = [1, 1]} : vector<8x128xf32> to vector<8x32xf32>
    %55 = vector.extract_strided_slice %52 {offsets = [0, 64], sizes = [8, 32], strides = [1, 1]} : vector<8x128xf32> to vector<8x32xf32>
    %56 = vector.extract_strided_slice %52 {offsets = [0, 96], sizes = [8, 32], strides = [1, 1]} : vector<8x128xf32> to vector<8x32xf32>
    %57 = arith.mulf %54, %37 : vector<8x32xf32>
    %58 = arith.mulf %53, %55 : vector<8x32xf32>
    %59 = arith.addf %57, %58 : vector<8x32xf32>
    %60 = math.tanh %59 : vector<8x32xf32>
    %61 = arith.mulf %56, %60 : vector<8x32xf32>
    %c2_i32 = arith.constant 2 : i32
    %c8_i32_16 = arith.constant 8 : i32
    %62 = arith.muli %c2_i32, %c8_i32_16 : i32
    %63 = tpu.assume_multiple %62, 8 : i32
    %64 = arith.index_cast %63 : i32 to index
    %c0_17 = arith.constant 0 : index
    %65 = vector.load %arg4[%64, %c0_17] : memref<64x128xf32, #tpu.memory_space<vmem>>, vector<8x128xf32>
    %cst_18 = arith.constant dense<0.000000e+00> : vector<8x128xf32>
    %66 = tpu.matmul %61, %9, %cst_18 {dimension_numbers = #tpu.dot_dimension_numbers<[1], [0], [0], [1], [0, 0, 1, 1], [], []>} : vector<8x32xf32>, vector<32x128xf32>, vector<8x128xf32> -> vector<8x128xf32>
    %67 = arith.addf %65, %66 : vector<8x128xf32>
    %68 = math.tanh %67 : vector<8x128xf32>
    %69 = arith.negf %67 : vector<8x128xf32>
    %70 = math.exp %69 : vector<8x128xf32>
    %cst_19 = arith.constant 1.000000e+00 : f32
    %71 = vector.broadcast %cst_19 : f32 to vector<8x128xf32>
    %72 = arith.addf %71, %70 : vector<8x128xf32>
    %73 = arith.divf %71, %72 : vector<8x128xf32>
    %74 = arith.select %15, %68, %73 : vector<8x128xi1>, vector<8x128xf32>
    %75 = vector.extract_strided_slice %74 {offsets = [0, 0], sizes = [8, 32], strides = [1, 1]} : vector<8x128xf32> to vector<8x32xf32>
    %76 = vector.extract_strided_slice %74 {offsets = [0, 32], sizes = [8, 32], strides = [1, 1]} : vector<8x128xf32> to vector<8x32xf32>
    %77 = vector.extract_strided_slice %74 {offsets = [0, 64], sizes = [8, 32], strides = [1, 1]} : vector<8x128xf32> to vector<8x32xf32>
    %78 = vector.extract_strided_slice %74 {offsets = [0, 96], sizes = [8, 32], strides = [1, 1]} : vector<8x128xf32> to vector<8x32xf32>
    %79 = arith.mulf %76, %59 : vector<8x32xf32>
    %80 = arith.mulf %75, %77 : vector<8x32xf32>
    %81 = arith.addf %79, %80 : vector<8x32xf32>
    %82 = math.tanh %81 : vector<8x32xf32>
    %83 = arith.mulf %78, %82 : vector<8x32xf32>
    %c3_i32 = arith.constant 3 : i32
    %c8_i32_20 = arith.constant 8 : i32
    %84 = arith.muli %c3_i32, %c8_i32_20 : i32
    %85 = tpu.assume_multiple %84, 8 : i32
    %86 = arith.index_cast %85 : i32 to index
    %c0_21 = arith.constant 0 : index
    %87 = vector.load %arg4[%86, %c0_21] : memref<64x128xf32, #tpu.memory_space<vmem>>, vector<8x128xf32>
    %cst_22 = arith.constant dense<0.000000e+00> : vector<8x128xf32>
    %88 = tpu.matmul %83, %9, %cst_22 {dimension_numbers = #tpu.dot_dimension_numbers<[1], [0], [0], [1], [0, 0, 1, 1], [], []>} : vector<8x32xf32>, vector<32x128xf32>, vector<8x128xf32> -> vector<8x128xf32>
    %89 = arith.addf %87, %88 : vector<8x128xf32>
    %90 = math.tanh %89 : vector<8x128xf32>
    %91 = arith.negf %89 : vector<8x128xf32>
    %92 = math.exp %91 : vector<8x128xf32>
    %cst_23 = arith.constant 1.000000e+00 : f32
    %93 = vector.broadcast %cst_23 : f32 to vector<8x128xf32>
    %94 = arith.addf %93, %92 : vector<8x128xf32>
    %95 = arith.divf %93, %94 : vector<8x128xf32>
    %96 = arith.select %15, %90, %95 : vector<8x128xi1>, vector<8x128xf32>
    %97 = vector.extract_strided_slice %96 {offsets = [0, 0], sizes = [8, 32], strides = [1, 1]} : vector<8x128xf32> to vector<8x32xf32>
    %98 = vector.extract_strided_slice %96 {offsets = [0, 32], sizes = [8, 32], strides = [1, 1]} : vector<8x128xf32> to vector<8x32xf32>
    %99 = vector.extract_strided_slice %96 {offsets = [0, 64], sizes = [8, 32], strides = [1, 1]} : vector<8x128xf32> to vector<8x32xf32>
    %100 = vector.extract_strided_slice %96 {offsets = [0, 96], sizes = [8, 32], strides = [1, 1]} : vector<8x128xf32> to vector<8x32xf32>
    %101 = arith.mulf %98, %81 : vector<8x32xf32>
    %102 = arith.mulf %97, %99 : vector<8x32xf32>
    %103 = arith.addf %101, %102 : vector<8x32xf32>
    %104 = math.tanh %103 : vector<8x32xf32>
    %105 = arith.mulf %100, %104 : vector<8x32xf32>
    %c4_i32 = arith.constant 4 : i32
    %c8_i32_24 = arith.constant 8 : i32
    %106 = arith.muli %c4_i32, %c8_i32_24 : i32
    %107 = tpu.assume_multiple %106, 8 : i32
    %108 = arith.index_cast %107 : i32 to index
    %c0_25 = arith.constant 0 : index
    %109 = vector.load %arg4[%108, %c0_25] : memref<64x128xf32, #tpu.memory_space<vmem>>, vector<8x128xf32>
    %cst_26 = arith.constant dense<0.000000e+00> : vector<8x128xf32>
    %110 = tpu.matmul %105, %9, %cst_26 {dimension_numbers = #tpu.dot_dimension_numbers<[1], [0], [0], [1], [0, 0, 1, 1], [], []>} : vector<8x32xf32>, vector<32x128xf32>, vector<8x128xf32> -> vector<8x128xf32>
    %111 = arith.addf %109, %110 : vector<8x128xf32>
    %112 = math.tanh %111 : vector<8x128xf32>
    %113 = arith.negf %111 : vector<8x128xf32>
    %114 = math.exp %113 : vector<8x128xf32>
    %cst_27 = arith.constant 1.000000e+00 : f32
    %115 = vector.broadcast %cst_27 : f32 to vector<8x128xf32>
    %116 = arith.addf %115, %114 : vector<8x128xf32>
    %117 = arith.divf %115, %116 : vector<8x128xf32>
    %118 = arith.select %15, %112, %117 : vector<8x128xi1>, vector<8x128xf32>
    %119 = vector.extract_strided_slice %118 {offsets = [0, 0], sizes = [8, 32], strides = [1, 1]} : vector<8x128xf32> to vector<8x32xf32>
    %120 = vector.extract_strided_slice %118 {offsets = [0, 32], sizes = [8, 32], strides = [1, 1]} : vector<8x128xf32> to vector<8x32xf32>
    %121 = vector.extract_strided_slice %118 {offsets = [0, 64], sizes = [8, 32], strides = [1, 1]} : vector<8x128xf32> to vector<8x32xf32>
    %122 = vector.extract_strided_slice %118 {offsets = [0, 96], sizes = [8, 32], strides = [1, 1]} : vector<8x128xf32> to vector<8x32xf32>
    %123 = arith.mulf %120, %103 : vector<8x32xf32>
    %124 = arith.mulf %119, %121 : vector<8x32xf32>
    %125 = arith.addf %123, %124 : vector<8x32xf32>
    %126 = math.tanh %125 : vector<8x32xf32>
    %127 = arith.mulf %122, %126 : vector<8x32xf32>
    %c5_i32 = arith.constant 5 : i32
    %c8_i32_28 = arith.constant 8 : i32
    %128 = arith.muli %c5_i32, %c8_i32_28 : i32
    %129 = tpu.assume_multiple %128, 8 : i32
    %130 = arith.index_cast %129 : i32 to index
    %c0_29 = arith.constant 0 : index
    %131 = vector.load %arg4[%130, %c0_29] : memref<64x128xf32, #tpu.memory_space<vmem>>, vector<8x128xf32>
    %cst_30 = arith.constant dense<0.000000e+00> : vector<8x128xf32>
    %132 = tpu.matmul %127, %9, %cst_30 {dimension_numbers = #tpu.dot_dimension_numbers<[1], [0], [0], [1], [0, 0, 1, 1], [], []>} : vector<8x32xf32>, vector<32x128xf32>, vector<8x128xf32> -> vector<8x128xf32>
    %133 = arith.addf %131, %132 : vector<8x128xf32>
    %134 = math.tanh %133 : vector<8x128xf32>
    %135 = arith.negf %133 : vector<8x128xf32>
    %136 = math.exp %135 : vector<8x128xf32>
    %cst_31 = arith.constant 1.000000e+00 : f32
    %137 = vector.broadcast %cst_31 : f32 to vector<8x128xf32>
    %138 = arith.addf %137, %136 : vector<8x128xf32>
    %139 = arith.divf %137, %138 : vector<8x128xf32>
    %140 = arith.select %15, %134, %139 : vector<8x128xi1>, vector<8x128xf32>
    %141 = vector.extract_strided_slice %140 {offsets = [0, 0], sizes = [8, 32], strides = [1, 1]} : vector<8x128xf32> to vector<8x32xf32>
    %142 = vector.extract_strided_slice %140 {offsets = [0, 32], sizes = [8, 32], strides = [1, 1]} : vector<8x128xf32> to vector<8x32xf32>
    %143 = vector.extract_strided_slice %140 {offsets = [0, 64], sizes = [8, 32], strides = [1, 1]} : vector<8x128xf32> to vector<8x32xf32>
    %144 = vector.extract_strided_slice %140 {offsets = [0, 96], sizes = [8, 32], strides = [1, 1]} : vector<8x128xf32> to vector<8x32xf32>
    %145 = arith.mulf %142, %125 : vector<8x32xf32>
    %146 = arith.mulf %141, %143 : vector<8x32xf32>
    %147 = arith.addf %145, %146 : vector<8x32xf32>
    %148 = math.tanh %147 : vector<8x32xf32>
    %149 = arith.mulf %144, %148 : vector<8x32xf32>
    %c6_i32 = arith.constant 6 : i32
    %c8_i32_32 = arith.constant 8 : i32
    %150 = arith.muli %c6_i32, %c8_i32_32 : i32
    %151 = tpu.assume_multiple %150, 8 : i32
    %152 = arith.index_cast %151 : i32 to index
    %c0_33 = arith.constant 0 : index
    %153 = vector.load %arg4[%152, %c0_33] : memref<64x128xf32, #tpu.memory_space<vmem>>, vector<8x128xf32>
    %cst_34 = arith.constant dense<0.000000e+00> : vector<8x128xf32>
    %154 = tpu.matmul %149, %9, %cst_34 {dimension_numbers = #tpu.dot_dimension_numbers<[1], [0], [0], [1], [0, 0, 1, 1], [], []>} : vector<8x32xf32>, vector<32x128xf32>, vector<8x128xf32> -> vector<8x128xf32>
    %155 = arith.addf %153, %154 : vector<8x128xf32>
    %156 = math.tanh %155 : vector<8x128xf32>
    %157 = arith.negf %155 : vector<8x128xf32>
    %158 = math.exp %157 : vector<8x128xf32>
    %cst_35 = arith.constant 1.000000e+00 : f32
    %159 = vector.broadcast %cst_35 : f32 to vector<8x128xf32>
    %160 = arith.addf %159, %158 : vector<8x128xf32>
    %161 = arith.divf %159, %160 : vector<8x128xf32>
    %162 = arith.select %15, %156, %161 : vector<8x128xi1>, vector<8x128xf32>
    %163 = vector.extract_strided_slice %162 {offsets = [0, 0], sizes = [8, 32], strides = [1, 1]} : vector<8x128xf32> to vector<8x32xf32>
    %164 = vector.extract_strided_slice %162 {offsets = [0, 32], sizes = [8, 32], strides = [1, 1]} : vector<8x128xf32> to vector<8x32xf32>
    %165 = vector.extract_strided_slice %162 {offsets = [0, 64], sizes = [8, 32], strides = [1, 1]} : vector<8x128xf32> to vector<8x32xf32>
    %166 = vector.extract_strided_slice %162 {offsets = [0, 96], sizes = [8, 32], strides = [1, 1]} : vector<8x128xf32> to vector<8x32xf32>
    %167 = arith.mulf %164, %147 : vector<8x32xf32>
    %168 = arith.mulf %163, %165 : vector<8x32xf32>
    %169 = arith.addf %167, %168 : vector<8x32xf32>
    %170 = math.tanh %169 : vector<8x32xf32>
    %171 = arith.mulf %166, %170 : vector<8x32xf32>
    %c7_i32 = arith.constant 7 : i32
    %c8_i32_36 = arith.constant 8 : i32
    %172 = arith.muli %c7_i32, %c8_i32_36 : i32
    %173 = tpu.assume_multiple %172, 8 : i32
    %174 = arith.index_cast %173 : i32 to index
    %c0_37 = arith.constant 0 : index
    %175 = vector.load %arg4[%174, %c0_37] : memref<64x128xf32, #tpu.memory_space<vmem>>, vector<8x128xf32>
    %cst_38 = arith.constant dense<0.000000e+00> : vector<8x128xf32>
    %176 = tpu.matmul %171, %9, %cst_38 {dimension_numbers = #tpu.dot_dimension_numbers<[1], [0], [0], [1], [0, 0, 1, 1], [], []>} : vector<8x32xf32>, vector<32x128xf32>, vector<8x128xf32> -> vector<8x128xf32>
    %177 = arith.addf %175, %176 : vector<8x128xf32>
    %178 = math.tanh %177 : vector<8x128xf32>
    %179 = arith.negf %177 : vector<8x128xf32>
    %180 = math.exp %179 : vector<8x128xf32>
    %cst_39 = arith.constant 1.000000e+00 : f32
    %181 = vector.broadcast %cst_39 : f32 to vector<8x128xf32>
    %182 = arith.addf %181, %180 : vector<8x128xf32>
    %183 = arith.divf %181, %182 : vector<8x128xf32>
    %184 = arith.select %15, %178, %183 : vector<8x128xi1>, vector<8x128xf32>
    %185 = vector.extract_strided_slice %184 {offsets = [0, 0], sizes = [8, 32], strides = [1, 1]} : vector<8x128xf32> to vector<8x32xf32>
    %186 = vector.extract_strided_slice %184 {offsets = [0, 32], sizes = [8, 32], strides = [1, 1]} : vector<8x128xf32> to vector<8x32xf32>
    %187 = vector.extract_strided_slice %184 {offsets = [0, 64], sizes = [8, 32], strides = [1, 1]} : vector<8x128xf32> to vector<8x32xf32>
    %188 = vector.extract_strided_slice %184 {offsets = [0, 96], sizes = [8, 32], strides = [1, 1]} : vector<8x128xf32> to vector<8x32xf32>
    %189 = arith.mulf %186, %169 : vector<8x32xf32>
    %190 = arith.mulf %185, %187 : vector<8x32xf32>
    %191 = arith.addf %189, %190 : vector<8x32xf32>
    %192 = math.tanh %191 : vector<8x32xf32>
    %193 = arith.mulf %188, %192 : vector<8x32xf32>
    %c8_i32_40 = arith.constant 8 : i32
    %cst_41 = arith.constant 0.000000e+00 : f32
    %194 = vector.broadcast %cst_41 : f32 to vector<8x64xf32>
    %195 = tpu.concatenate %193, %191, %194 in 1 : vector<8x32xf32>, vector<8x32xf32>, vector<8x64xf32> -> vector<8x128xf32>
    %c0_42 = arith.constant 0 : index
    %c0_43 = arith.constant 0 : index
    %196 = vector.load %arg3[%c0_42, %c0_43] : memref<8x128xf32, #tpu.memory_space<vmem>>, vector<8x128xf32>
    tpu.vector_store %arg3[%c0_42, %c0_43], %195 {strides = array<i32>} : memref<8x128xf32, #tpu.memory_space<vmem>>, vector<8x128xf32>,
    return
  }
}

</mosaic_0001>

<bundles_post_ra>
// kernel: encoder_forward.1
= control target key start
LH: loop header
LB: loop body
LE: loop exit
PB: predicated region body
PF: predicated region fallthrough
CT: control target
= control target key end

     0   :  { %v1309_v0 = vmov 0   ;;  %v1310_v2 = vmov 0.0   ;;  %vm1311_vm0 = vmmov 0   ;;  %v22_v10 = vlaneseq  ;;  %s1572_s0 = inlined_call_operand.vmem [shape: s32[64,1], index: 0, kind: input, shape index: {}]   ;;  %s1573_s2 = inlined_call_operand.vmem [shape: f32[32,128], index: 2, kind: input, shape index: {}]   ;;  %s1574_s1 = inlined_call_operand.vmem [shape: f32[16,128], index: 1, kind: input, shape index: {}]   ;;  %s1575_s3 = inlined_call_operand.vmem [shape: f32[8,128], index: 3, kind: output, shape index: {}]  }
   0x1   :  { %1243 = vset.pattern.permute.xlu0 %v1309_v0  ;;  %v14_v1 = vld [vmem:[%s1572_s0] sm:$0xff]  ;;  %1150 = vmatprep.subr.mxu1 %v1310_v2  ;;  %v1341_v3 = vld [vmem:[%s1573_s2 + $0x18] sm:$0xff]  ;;  %v1347_v4 = vld [vmem:[%s1573_s2 + $0x10] sm:$0xff]  ;;  %vm74_vm1 = vcmask 130048   ;;  %vm220_vm7 = vcmask 261120   ;;  %vm1046_vm14 = vcmask 523264  }
   0x2   :  { %25 = vperm.xlu0 %1243, %v14_v1   ;;  %1151 = vmatpush3.msra.mxu1 %v1341_v3  ;;  %v73_v5 = vld [vmem:[%s1574_s1 + $0x8] sm:$0xff]  ;;  %v72_v8 = vld [vmem:[%s1574_s1] sm:$0xff]  ;;  %v1389_v11 = vand.u32 127, %v22_v10  ;;  %s1312_s1 = smov 64   ;;  %v16_v48 = vld [vmem:[%s1572_s0 + $0x10] sm:$0xff] }
   0x3   :  { %v15_v6 = vld [vmem:[%s1572_s0 + $0x8] sm:$0xff]  ;;  %1152 = vmatprep.subr.mxu1 %v1310_v2  ;;  %1134 = vmatprep.subr.mxu0 %v73_v5  ;;  %v1369_v9 = vld [vmem:[%s1573_s2] sm:$0xff]  ;;  %v20_v50 = vld [vmem:[%s1572_s0 + $0x30] sm:$0xff] }
   0x4   :  { %v1359_v7 = vld [vmem:[%s1573_s2 + $0x8] sm:$0xff]  ;;  %1153 = vmatpush3.msra.mxu1 %v1347_v4  ;;  %1135 = vmatpush3.msra.mxu0 %v73_v5  ;;  %vm216_vm4 = vcmp.ge.s32.totalorder %v1389_v11, 64  ;;  %vm217_vm5 = vcmp.lt.s32.totalorder %v1389_v11, 96  ;;  %s1313_s2 = smov 32   ;;  %v18_v49 = vld [vmem:[%s1572_s0 + $0x20] sm:$0xff]  ;;  %v17_v57 = vld [vmem:[%s1572_s0 + $0x18] sm:$0xff] }
   0x5   :  { %1154 = vmatprep.subr.mxu1 %v1310_v2  ;;  %1136 = vmatprep.subr.mxu0 %v72_v8  ;;  %vm1407_vm6 = vmand %vm216_vm4, %vm217_vm5  ;;  %v19_v58 = vld [vmem:[%s1572_s0 + $0x28] sm:$0xff]  ;;  %v21_v59 = vld [vmem:[%s1572_s0 + $0x38] sm:$0xff] }
   0x6   :  { %28 = vperm.xlu0 %1243, %v15_v6   ;;  %1155 = vmatpush3.msra.mxu1 %v1359_v7 }
   0x7   :  { %1156 = vmatprep.subr.mxu1 %v1310_v2  ;;  %1137 = vmatpush3.msra.mxu0 %v72_v8 }
   0x8   :  { %1157 = vmatpush3.msra.mxu1 %v1369_v9  ;;  %1158 = vmatprep.mubr.msk.f32.mxu1 %vm1311_vm0, %v1310_v2 }
   0x9   :  { %1159 = vmatmul.mubr.f32.vlgmr.msra.gmra.mxu1 %v1310_v2  ;;  %1161 = vmatprep.subr.mxu1 %v1310_v2 }
   0xa   :  { %1162 = vmatpush3.msra.mxu1 %v1341_v3  ;;  %1169 = vmatprep.mubr.msk.f32.mxu1 %vm1311_vm0, %v1310_v2 }
   0xb   :  { %1163 = vmatprep.subr.mxu1 %v1310_v2  ;;  %1244 = vset.pattern.permute.xlu1 %v1309_v0 }
   0xc   :  { %1164 = vmatpush3.msra.mxu1 %v1347_v4  ;;  %1172 = vmatprep.subr.mxu0 %v1310_v2 }
   0xd   :  { %1165 = vmatprep.subr.mxu1 %v1310_v2 }
   0xe   :  { %1166 = vmatpush3.msra.mxu1 %v1359_v7 }
   0xf   :  { %1167 = vmatprep.subr.mxu1 %v1310_v2 }
  0x10   :  { %1168 = vmatpush3.msra.mxu1 %v1369_v9 }
  0x11   :  { %1183 = vmatprep.subr.mxu1 %v1310_v2 }
  0x7d   :  { %v26_v12 = vpop.permute.xlu0 %25 }
  0x7e   :  { %vm48_vm2 = vcmp.eq.s32.totalorder %v26_v12, %v1389_v11 }
  0x7f   :  { %v1053_v13 = vsel %vm48_vm2, 1.0, %v1310_v2 }
  0x80   :  { %1138 = vmatprep.mubr.msk.f32.mxu0 %vm74_vm1, %v1053_v13 }
  0x81   :  { %v29_v14 = vpop.permute.xlu0 %28 }
  0x82   :  { %vm49_vm3 = vcmp.eq.s32.totalorder %v29_v14, %v1389_v11 }
  0x83   :  { %v1054_v15 = vsel %vm49_vm3, 1.0, %v1310_v2 }
  0x84   :  { %1139 = vmatmul.mubr.msk.f32.vlgmr.msra.gmra.mxu0 %vm74_vm1, %v1054_v15 }
  0x85   :  { %1173 = vmatpush3.msra.mxu0 %v1341_v3 }
  0x86   :  { %1174 = vmatprep.subr.mxu0 %v1310_v2 }
  0x87   :  { %1175 = vmatpush3.msra.mxu0 %v1347_v4 }
  0x88   :  { %1176 = vmatprep.subr.mxu0 %v1310_v2 }
  0x89   :  { %1177 = vmatpush3.msra.mxu0 %v1359_v7 }
  0x8a   :  { %1178 = vmatprep.subr.mxu0 %v1310_v2 }
  0x8b   :  { %1179 = vmatpush3.msra.mxu0 %v1369_v9 }
  0x8c   :  { %1194 = vmatprep.subr.mxu0 %v1310_v2 }
  0xc9   :  { %v290_v16 = vpop.f32.mrf.mxu1 }
  0xcb   :  { %v1160_v17 = vpop.f32.mrf.mxu1 }
 0x144   :  { %v1140_v18 = vpop.f32.mrf.mxu0 }
 0x146   :  { %v165_v19 = vpop.f32.mrf.mxu0 }
 0x147   :  { %v294_v20 = vadd.f32 %v290_v16, %v165_v19 }
 0x149   :  { %v1069_v21 = vmul.f32 -1.442695, %v294_v20 }
 0x14b   :  { %1245 = vpow2.f32 %v1069_v21 }
 0x14c   :  { %1247 = vtanh.f32 %v294_v20 }
 0x158   :  { %v1246_v22 = vpop.eup %1245 }
 0x159   :  { %v299_v23 = vadd.f32 1.0, %v1246_v22  ;;  %v1248_v25 = vpop.eup %1247 }
 0x15b   :  { %1249 = vrcp.f32 %v299_v23 }
 0x168   :  { %v1250_v26 = vpop.eup %1249 }
 0x169   :  { %v302_v27 = vsel %vm1407_vm6, %v1248_v25, %v1250_v26 }
 0x16a   :  { %305 = vrot.lane.b32.xlu1 %v302_v27, %s1312_s1  ;;  %v303_v30 = vmul.f32 0.0, %v302_v27 }
 0x1dc   :  { %v306_v28 = vpop.permute.xlu1 %305 }
 0x1dd   :  { %v308_v29 = vmul.f32 %v306_v28, %v302_v27 }
 0x1df   :  { %310 = vrot.lane.b32.xlu1 %v308_v29, %s1313_s2 }
 0x251   :  { %v311_v31 = vpop.permute.xlu1 %310 }
 0x252   :  { %v313_v32 = vadd.f32 %v311_v31, %v303_v30 }
 0x254   :  { %1251 = vtanh.f32 %v313_v32 }
 0x261   :  { %v1252_v33 = vpop.eup %1251 }
 0x262   :  { %316 = vrot.lane.b32.xlu0 %v1252_v33, %s1312_s1 }
 0x2d4   :  { %v317_v34 = vpop.permute.xlu0 %316 }
 0x2d5   :  { %v319_v35 = vmul.f32 %v317_v34, %v302_v27 }
 0x2d7   :  { %323 = vrot.lane.b32.xlu1 %v319_v35, %s1313_s2 }
 0x349   :  { %v324_v36 = vpop.permute.xlu1 %323 }
 0x34a   :  { %1170 = vmatmul.mubr.msk.f32.vlgmr.msra.gmra.mxu1 %vm220_vm7, %v324_v36 }
 0x34b   :  { %1184 = vmatpush3.msra.mxu1 %v1341_v3  ;;  %1191 = vmatprep.mubr.msk.f32.mxu1 %vm1311_vm0, %v1310_v2 }
 0x34c   :  { %1185 = vmatprep.subr.mxu1 %v1310_v2 }
 0x34d   :  { %1186 = vmatpush3.msra.mxu1 %v1347_v4 }
 0x34e   :  { %1187 = vmatprep.subr.mxu1 %v1310_v2 }
 0x34f   :  { %1188 = vmatpush3.msra.mxu1 %v1359_v7 }
 0x350   :  { %1189 = vmatprep.subr.mxu1 %v1310_v2 }
 0x351   :  { %1190 = vmatpush3.msra.mxu1 %v1369_v9 }
 0x352   :  { %1205 = vmatprep.subr.mxu1 %v1310_v2 }
 0x40a   :  { %v393_v37 = vpop.f32.mrf.mxu1 }
 0x40b   :  { %v397_v38 = vadd.f32 %v1140_v18, %v393_v37 }
 0x40c   :  { %v1171_v39 = vpop.f32.mrf.mxu1 }
 0x40d   :  { %v1071_v40 = vmul.f32 -1.442695, %v397_v38 }
 0x40f   :  { %1253 = vpow2.f32 %v1071_v40 }
 0x410   :  { %1255 = vtanh.f32 %v397_v38 }
 0x41c   :  { %v1254_v41 = vpop.eup %1253 }
 0x41d   :  { %v402_v42 = vadd.f32 1.0, %v1254_v41  ;;  %v1256_v43 = vpop.eup %1255 }
 0x41f   :  { %1257 = vrcp.f32 %v402_v42 }
 0x42c   :  { %v1258_v44 = vpop.eup %1257 }
 0x42d   :  { %v405_v45 = vsel %vm1407_vm6, %v1256_v43, %v1258_v44 }
 0x42e   :  { %408 = vrot.lane.b32.xlu0 %v405_v45, %s1312_s1  ;;  %v406_v51 = vmul.f32 %v405_v45, %v313_v32 }
 0x4a0   :  { %v409_v46 = vpop.permute.xlu0 %408 }
 0x4a1   :  { %v411_v47 = vmul.f32 %v409_v46, %v405_v45 }
 0x4a3   :  { %413 = vrot.lane.b32.xlu1 %v411_v47, %s1313_s2 }
 0x4a7   :  { %31 = vperm.xlu1 %1244, %v16_v48  }
 0x4ab   :  { %37 = vperm.xlu1 %1244, %v18_v49  }
 0x4af   :  { %43 = vperm.xlu1 %1244, %v20_v50  }
 0x515   :  { %v414_v52 = vpop.permute.xlu1 %413 }
 0x516   :  { %v1441_v53 = vadd.f32 %v414_v52, %v406_v51 }
 0x518   :  { %1259 = vtanh.f32 %v1441_v53 }
 0x522   :  { %v32_v54 = vpop.permute.xlu1 %31 }
 0x523   :  { %vm50_vm8 = vcmp.eq.s32.totalorder %v32_v54, %v1389_v11 }
 0x524   :  { %v1055_v55 = vsel %vm50_vm8, 1.0, %v1310_v2 }
 0x525   :  { %v1260_v56 = vpop.eup %1259  ;;  %1141 = vmatprep.mubr.msk.f32.mxu0 %vm74_vm1, %v1055_v55 }
 0x526   :  { %419 = vrot.lane.b32.xlu0 %v1260_v56, %s1312_s1  ;;  %v38_v62 = vpop.permute.xlu1 %37 }
 0x527   :  { %vm52_vm9 = vcmp.eq.s32.totalorder %v38_v62, %v1389_v11 }
 0x528   :  { %v1057_v1 = vsel %vm52_vm9, 1.0, %v1310_v2 }
 0x52a   :  { %34 = vperm.xlu0 %1243, %v17_v57   ;;  %v44_v63 = vpop.permute.xlu1 %43 }
 0x52b   :  { %vm54_vm11 = vcmp.eq.s32.totalorder %v44_v63, %v1389_v11 }
 0x52c   :  { %v1059_v8 = vsel %vm54_vm11, 1.0, %v1310_v2 }
 0x52e   :  { %40 = vperm.xlu0 %1243, %v19_v58  }
 0x532   :  { %46 = vperm.xlu0 %1243, %v21_v59  }
 0x598   :  { %v420_v60 = vpop.permute.xlu0 %419 }
 0x599   :  { %v422_v61 = vmul.f32 %v420_v60, %v405_v45 }
 0x59b   :  { %426 = vrot.lane.b32.xlu1 %v422_v61, %s1313_s2 }
 0x5a5   :  { %v35_v0 = vpop.permute.xlu0 %34 }
 0x5a6   :  { %vm51_vm10 = vcmp.eq.s32.totalorder %v35_v0, %v1389_v11 }
 0x5a7   :  { %v1056_v5 = vsel %vm51_vm10, 1.0, %v1310_v2 }
 0x5a8   :  { %1142 = vmatmul.mubr.msk.f32.gmra.mxu0 %vm74_vm1, %v1056_v5 }
 0x5a9   :  { %v41_v6 = vpop.permute.xlu0 %40  ;;  %1144 = vmatprep.mubr.msk.f32.mxu0 %vm74_vm1, %v1057_v1 }
 0x5aa   :  { %vm53_vm12 = vcmp.eq.s32.totalorder %v41_v6, %v1389_v11 }
 0x5ab   :  { %v1058_v10 = vsel %vm53_vm12, 1.0, %v1310_v2 }
 0x5ac   :  { %1145 = vmatmul.mubr.msk.f32.gmra.mxu0 %vm74_vm1, %v1058_v10 }
 0x5ad   :  { %v47_v12 = vpop.permute.xlu0 %46  ;;  %1147 = vmatprep.mubr.msk.f32.mxu0 %vm74_vm1, %v1059_v8 }
 0x5ae   :  { %vm55_vm13 = vcmp.eq.s32.totalorder %v47_v12, %v1389_v11 }
 0x5af   :  { %v1060_v13 = vsel %vm55_vm13, 1.0, %v1310_v2 }
 0x5b0   :  { %1148 = vmatmul.mubr.msk.f32.gmra.mxu0 %vm74_vm1, %v1060_v13 }
 0x5b1   :  { %1180 = vmatprep.mubr.msk.f32.mxu0 %vm1311_vm0, %v1310_v2 }
 0x60d   :  { %v427_v14 = vpop.permute.xlu1 %426 }
 0x60e   :  { %1181 = vmatmul.mubr.msk.f32.vlgmr.msra.gmra.mxu0 %vm220_vm7, %v427_v14 }
 0x60f   :  { %1195 = vmatpush3.msra.mxu0 %v1341_v3  ;;  %1202 = vmatprep.mubr.msk.f32.mxu0 %vm1311_vm0, %v1310_v2 }
 0x610   :  { %1196 = vmatprep.subr.mxu0 %v1310_v2 }
 0x611   :  { %1197 = vmatpush3.msra.mxu0 %v1347_v4 }
 0x612   :  { %1198 = vmatprep.subr.mxu0 %v1310_v2 }
 0x613   :  { %1199 = vmatpush3.msra.mxu0 %v1359_v7 }
 0x614   :  { %1200 = vmatprep.subr.mxu0 %v1310_v2 }
 0x615   :  { %1201 = vmatpush3.msra.mxu0 %v1369_v9 }
 0x616   :  { %1216 = vmatprep.subr.mxu0 %v1310_v2 }
 0x668   :  { %v1143_v11 = vpop.f32.mrf.mxu0 }
 0x66a   :  { %v175_v15 = vpop.f32.mrf.mxu0 }
 0x66c   :  { %v1486_v16 = vpop.f32.mrf.mxu0 }
 0x66e   :  { %v1488_v17 = vpop.f32.mrf.mxu0 }
 0x670   :  { %v1490_v18 = vpop.f32.mrf.mxu0 }
 0x672   :  { %v1492_v19 = vpop.f32.mrf.mxu0 }
 0x6ce   :  { %v496_v20 = vpop.f32.mrf.mxu0 }
 0x6cf   :  { %v500_v21 = vadd.f32 %v496_v20, %v175_v15 }
 0x6d0   :  { %v1182_v22 = vpop.f32.mrf.mxu0 }
 0x6d1   :  { %v1073_v23 = vmul.f32 -1.442695, %v500_v21 }
 0x6d3   :  { %1261 = vpow2.f32 %v1073_v23 }
 0x6d4   :  { %1263 = vtanh.f32 %v500_v21 }
 0x6e0   :  { %v1262_v25 = vpop.eup %1261 }
 0x6e1   :  { %v505_v26 = vadd.f32 1.0, %v1262_v25  ;;  %v1264_v27 = vpop.eup %1263 }
 0x6e3   :  { %1265 = vrcp.f32 %v505_v26 }
 0x6f0   :  { %v1266_v28 = vpop.eup %1265 }
 0x6f1   :  { %v508_v29 = vsel %vm1407_vm6, %v1264_v27, %v1266_v28 }
 0x6f2   :  { %511 = vrot.lane.b32.xlu0 %v508_v29, %s1312_s1  ;;  %v509_v32 = vmul.f32 %v508_v29, %v1441_v53 }
 0x764   :  { %v512_v30 = vpop.permute.xlu0 %511 }
 0x765   :  { %v514_v31 = vmul.f32 %v512_v30, %v508_v29 }
 0x767   :  { %516 = vrot.lane.b32.xlu1 %v514_v31, %s1313_s2 }
 0x7d9   :  { %v517_v33 = vpop.permute.xlu1 %516 }
 0x7da   :  { %v519_v34 = vadd.f32 %v517_v33, %v509_v32 }
 0x7dc   :  { %1267 = vtanh.f32 %v519_v34 }
 0x7e9   :  { %v1268_v35 = vpop.eup %1267 }
 0x7ea   :  { %522 = vrot.lane.b32.xlu0 %v1268_v35, %s1312_s1 }
 0x85c   :  { %v523_v36 = vpop.permute.xlu0 %522 }
 0x85d   :  { %v525_v37 = vmul.f32 %v523_v36, %v508_v29 }
 0x85f   :  { %529 = vrot.lane.b32.xlu1 %v525_v37, %s1313_s2 }
 0x8d1   :  { %v530_v38 = vpop.permute.xlu1 %529 }
 0x8d2   :  { %1192 = vmatmul.mubr.msk.f32.vlgmr.msra.gmra.mxu1 %vm220_vm7, %v530_v38 }
 0x8d3   :  { %1206 = vmatpush3.msra.mxu1 %v1341_v3  ;;  %1213 = vmatprep.mubr.msk.f32.mxu1 %vm1311_vm0, %v1310_v2 }
 0x8d4   :  { %1207 = vmatprep.subr.mxu1 %v1310_v2 }
 0x8d5   :  { %1208 = vmatpush3.msra.mxu1 %v1347_v4 }
 0x8d6   :  { %1209 = vmatprep.subr.mxu1 %v1310_v2 }
 0x8d7   :  { %1210 = vmatpush3.msra.mxu1 %v1359_v7 }
 0x8d8   :  { %1211 = vmatprep.subr.mxu1 %v1310_v2 }
 0x8d9   :  { %1212 = vmatpush3.msra.mxu1 %v1369_v9 }
 0x8da   :  { %1227 = vmatprep.subr.mxu1 %v1310_v2 }
 0x992   :  { %v599_v39 = vpop.f32.mrf.mxu1 }
 0x993   :  { %v603_v40 = vadd.f32 %v1143_v11, %v599_v39 }
 0x994   :  { %v1193_v41 = vpop.f32.mrf.mxu1 }
 0x995   :  { %v1075_v42 = vmul.f32 -1.442695, %v603_v40 }
 0x997   :  { %1269 = vpow2.f32 %v1075_v42 }
 0x998   :  { %1271 = vtanh.f32 %v603_v40 }
 0x9a4   :  { %v1270_v43 = vpop.eup %1269 }
 0x9a5   :  { %v608_v44 = vadd.f32 1.0, %v1270_v43  ;;  %v1272_v45 = vpop.eup %1271 }
 0x9a7   :  { %1273 = vrcp.f32 %v608_v44 }
 0x9b4   :  { %v1274_v46 = vpop.eup %1273 }
 0x9b5   :  { %v611_v47 = vsel %vm1407_vm6, %v1272_v45, %v1274_v46 }
 0x9b6   :  { %614 = vrot.lane.b32.xlu0 %v611_v47, %s1312_s1  ;;  %v612_v50 = vmul.f32 %v611_v47, %v519_v34 }
 0xa28   :  { %v615_v48 = vpop.permute.xlu0 %614 }
 0xa29   :  { %v617_v49 = vmul.f32 %v615_v48, %v611_v47 }
 0xa2b   :  { %619 = vrot.lane.b32.xlu1 %v617_v49, %s1313_s2 }
 0xa9d   :  { %v620_v51 = vpop.permute.xlu1 %619 }
 0xa9e   :  { %v622_v52 = vadd.f32 %v620_v51, %v612_v50 }
 0xaa0   :  { %1275 = vtanh.f32 %v622_v52 }
 0xaad   :  { %v1276_v53 = vpop.eup %1275 }
 0xaae   :  { %625 = vrot.lane.b32.xlu0 %v1276_v53, %s1312_s1 }
 0xb20   :  { %v626_v54 = vpop.permute.xlu0 %625 }
 0xb21   :  { %v628_v55 = vmul.f32 %v626_v54, %v611_v47 }
 0xb23   :  { %632 = vrot.lane.b32.xlu1 %v628_v55, %s1313_s2 }
 0xb95   :  { %v633_v56 = vpop.permute.xlu1 %632 }
 0xb96   :  { %1203 = vmatmul.mubr.msk.f32.vlgmr.msra.gmra.mxu0 %vm220_vm7, %v633_v56 }
 0xb97   :  { %1217 = vmatpush3.msra.mxu0 %v1341_v3  ;;  %1224 = vmatprep.mubr.msk.f32.mxu0 %vm1311_vm0, %v1310_v2 }
 0xb98   :  { %1218 = vmatprep.subr.mxu0 %v1310_v2 }
 0xb99   :  { %1219 = vmatpush3.msra.mxu0 %v1347_v4 }
 0xb9a   :  { %1220 = vmatprep.subr.mxu0 %v1310_v2 }
 0xb9b   :  { %1221 = vmatpush3.msra.mxu0 %v1359_v7 }
 0xb9c   :  { %1222 = vmatprep.subr.mxu0 %v1310_v2 }
 0xb9d   :  { %1223 = vmatpush3.msra.mxu0 %v1369_v9 }
 0xc56   :  { %v702_v57 = vpop.f32.mrf.mxu0 }
 0xc57   :  { %v706_v58 = vadd.f32 %v702_v57, %v1488_v17 }
 0xc58   :  { %v1204_v59 = vpop.f32.mrf.mxu0 }
 0xc59   :  { %v1077_v60 = vmul.f32 -1.442695, %v706_v58 }
 0xc5b   :  { %1277 = vpow2.f32 %v1077_v60 }
 0xc5c   :  { %1279 = vtanh.f32 %v706_v58 }
 0xc68   :  { %v1278_v61 = vpop.eup %1277 }
 0xc69   :  { %v711_v62 = vadd.f32 1.0, %v1278_v61  ;;  %v1280_v63 = vpop.eup %1279 }
 0xc6b   :  { %1281 = vrcp.f32 %v711_v62 }
 0xc78   :  { %v1282_v0 = vpop.eup %1281 }
 0xc79   :  { %v714_v1 = vsel %vm1407_vm6, %v1280_v63, %v1282_v0 }
 0xc7a   :  { %717 = vrot.lane.b32.xlu0 %v714_v1, %s1312_s1  ;;  %v715_v8 = vmul.f32 %v714_v1, %v622_v52 }
 0xcec   :  { %v718_v5 = vpop.permute.xlu0 %717 }
 0xced   :  { %v720_v6 = vmul.f32 %v718_v5, %v714_v1 }
 0xcef   :  { %722 = vrot.lane.b32.xlu1 %v720_v6, %s1313_s2 }
 0xd61   :  { %v723_v10 = vpop.permute.xlu1 %722 }
 0xd62   :  { %v725_v12 = vadd.f32 %v723_v10, %v715_v8 }
 0xd64   :  { %1283 = vtanh.f32 %v725_v12 }
 0xd71   :  { %v1284_v13 = vpop.eup %1283 }
 0xd72   :  { %728 = vrot.lane.b32.xlu0 %v1284_v13, %s1312_s1 }
 0xde4   :  { %v729_v14 = vpop.permute.xlu0 %728 }
 0xde5   :  { %v731_v11 = vmul.f32 %v729_v14, %v714_v1 }
 0xde7   :  { %735 = vrot.lane.b32.xlu1 %v731_v11, %s1313_s2 }
 0xe59   :  { %v736_v15 = vpop.permute.xlu1 %735 }
 0xe5a   :  { %1214 = vmatmul.mubr.msk.f32.vlgmr.msra.gmra.mxu1 %vm220_vm7, %v736_v15 }
 0xe5b   :  { %1228 = vmatpush3.msra.mxu1 %v1341_v3  ;;  %1235 = vmatprep.mubr.msk.f32.mxu1 %vm1311_vm0, %v1310_v2 }
 0xe5c   :  { %1229 = vmatprep.subr.mxu1 %v1310_v2 }
 0xe5d   :  { %1230 = vmatpush3.msra.mxu1 %v1347_v4 }
 0xe5e   :  { %1231 = vmatprep.subr.mxu1 %v1310_v2 }
 0xe5f   :  { %1232 = vmatpush3.msra.mxu1 %v1359_v7 }
 0xe60   :  { %1233 = vmatprep.subr.mxu1 %v1310_v2 }
 0xe61   :  { %1234 = vmatpush3.msra.mxu1 %v1369_v9 }
 0xf1a   :  { %v805_v17 = vpop.f32.mrf.mxu1 }
 0xf1b   :  { %v809_v20 = vadd.f32 %v1486_v16, %v805_v17 }
 0xf1c   :  { %v1215_v21 = vpop.f32.mrf.mxu1 }
 0xf1d   :  { %v1079_v3 = vmul.f32 -1.442695, %v809_v20 }
 0xf1f   :  { %1285 = vpow2.f32 %v1079_v3 }
 0xf20   :  { %1287 = vtanh.f32 %v809_v20 }
 0xf2c   :  { %v1286_v22 = vpop.eup %1285 }
 0xf2d   :  { %v814_v23 = vadd.f32 1.0, %v1286_v22  ;;  %v1288_v25 = vpop.eup %1287 }
 0xf2f   :  { %1289 = vrcp.f32 %v814_v23 }
 0xf3c   :  { %v1290_v4 = vpop.eup %1289 }
 0xf3d   :  { %v817_v26 = vsel %vm1407_vm6, %v1288_v25, %v1290_v4 }
 0xf3e   :  { %820 = vrot.lane.b32.xlu0 %v817_v26, %s1312_s1  ;;  %v818_v9 = vmul.f32 %v817_v26, %v725_v12 }
 0xfb0   :  { %v821_v2 = vpop.permute.xlu0 %820 }
 0xfb1   :  { %v823_v7 = vmul.f32 %v821_v2, %v817_v26 }
 0xfb3   :  { %825 = vrot.lane.b32.xlu1 %v823_v7, %s1313_s2 }
0x1025   :  { %v826_v16 = vpop.permute.xlu1 %825 }
0x1026   :  { %v828_v27 = vadd.f32 %v826_v16, %v818_v9 }
0x1028   :  { %1291 = vtanh.f32 %v828_v27 }
0x1035   :  { %v1292_v28 = vpop.eup %1291 }
0x1036   :  { %831 = vrot.lane.b32.xlu0 %v1292_v28, %s1312_s1 }
0x10a8   :  { %v832_v29 = vpop.permute.xlu0 %831 }
0x10a9   :  { %v834_v30 = vmul.f32 %v832_v29, %v817_v26 }
0x10ab   :  { %838 = vrot.lane.b32.xlu1 %v834_v30, %s1313_s2 }
0x111d   :  { %v839_v31 = vpop.permute.xlu1 %838 }
0x111e   :  { %1225 = vmatmul.mubr.msk.f32.vlgmr.msra.gmra.mxu0 %vm220_vm7, %v839_v31 }
0x11de   :  { %v908_v32 = vpop.f32.mrf.mxu0 }
0x11df   :  { %v912_v33 = vadd.f32 %v908_v32, %v1492_v19 }
0x11e0   :  { %v1226_v34 = vpop.f32.mrf.mxu0 }
0x11e1   :  { %v1081_v35 = vmul.f32 -1.442695, %v912_v33 }
0x11e3   :  { %1293 = vpow2.f32 %v1081_v35 }
0x11e4   :  { %1295 = vtanh.f32 %v912_v33 }
0x11f0   :  { %v1294_v36 = vpop.eup %1293 }
0x11f1   :  { %v917_v37 = vadd.f32 1.0, %v1294_v36  ;;  %v1296_v38 = vpop.eup %1295 }
0x11f3   :  { %1297 = vrcp.f32 %v917_v37 }
0x1200   :  { %v1298_v39 = vpop.eup %1297 }
0x1201   :  { %v920_v40 = vsel %vm1407_vm6, %v1296_v38, %v1298_v39 }
0x1202   :  { %923 = vrot.lane.b32.xlu0 %v920_v40, %s1312_s1  ;;  %v921_v43 = vmul.f32 %v920_v40, %v828_v27 }
0x1274   :  { %v924_v41 = vpop.permute.xlu0 %923 }
0x1275   :  { %v926_v42 = vmul.f32 %v924_v41, %v920_v40 }
0x1277   :  { %928 = vrot.lane.b32.xlu1 %v926_v42, %s1313_s2 }
0x12e9   :  { %v929_v19 = vpop.permute.xlu1 %928 }
0x12ea   :  { %v931_v44 = vadd.f32 %v929_v19, %v921_v43 }
0x12ec   :  { %1299 = vtanh.f32 %v931_v44 }
0x12f9   :  { %v1300_v45 = vpop.eup %1299 }
0x12fa   :  { %934 = vrot.lane.b32.xlu0 %v1300_v45, %s1312_s1 }
0x136c   :  { %v935_v46 = vpop.permute.xlu0 %934 }
0x136d   :  { %v937_v47 = vmul.f32 %v935_v46, %v920_v40 }
0x136f   :  { %941 = vrot.lane.b32.xlu1 %v937_v47, %s1313_s2 }
0x13e1   :  { %v942_v48 = vpop.permute.xlu1 %941 }
0x13e2   :  { %1236 = vmatmul.mubr.msk.f32.vlgmr.msra.gmra.mxu1 %vm220_vm7, %v942_v48 }
0x14a2   :  { %v1011_v49 = vpop.f32.mrf.mxu1 }
0x14a3   :  { %v1015_v50 = vadd.f32 %v1490_v18, %v1011_v49 }
0x14a4   :  { %v1237_v51 = vpop.f32.mrf.mxu1 }
0x14a5   :  { %v1083_v52 = vmul.f32 -1.442695, %v1015_v50 }
0x14a7   :  { %1301 = vpow2.f32 %v1083_v52 }
0x14a8   :  { %1303 = vtanh.f32 %v1015_v50 }
0x14b4   :  { %v1302_v53 = vpop.eup %1301 }
0x14b5   :  { %v1020_v54 = vadd.f32 1.0, %v1302_v53  ;;  %v1304_v55 = vpop.eup %1303 }
0x14b7   :  { %1305 = vrcp.f32 %v1020_v54 }
0x14c4   :  { %v1306_v56 = vpop.eup %1305 }
0x14c5   :  { %v1023_v57 = vsel %vm1407_vm6, %v1304_v55, %v1306_v56 }
0x14c6   :  { %1026 = vrot.lane.b32.xlu0 %v1023_v57, %s1312_s1  ;;  %v1024_v60 = vmul.f32 %v1023_v57, %v931_v44 }
0x1538   :  { %v1027_v58 = vpop.permute.xlu0 %1026 }
0x1539   :  { %v1029_v59 = vmul.f32 %v1027_v58, %v1023_v57 }
0x153b   :  { %1031 = vrot.lane.b32.xlu1 %v1029_v59, %s1313_s2 }
0x15ad   :  { %v1032_v18 = vpop.permute.xlu1 %1031 }
0x15ae   :  { %v1034_v61 = vadd.f32 %v1032_v18, %v1024_v60 }
0x15b0   :  { %1307 = vtanh.f32 %v1034_v61 }
0x15bd   :  { %v1308_v62 = vpop.eup %1307 }
0x15be   :  { %1037 = vrot.lane.b32.xlu0 %v1308_v62, %s1312_s1 }
0x1630   :  { %v1038_v63 = vpop.permute.xlu0 %1037 }
0x1631   :  { %v1040_v0 = vmul.f32 %v1038_v63, %v1023_v57 }
0x1633   :  { %1042 = vrot.lane.b32.xlu1 %v1040_v0, %s1313_s2 }
0x16a5   :  { %v1043_v24 = vpop.permute.xlu1 %1042 }
0x16a6   :  { %v1045_v1 = vsel %vm220_vm7, %v1043_v24, %v1034_v61 }
0x16a7   :  { %v1047_v5 = vsel %vm1046_vm14, %v1045_v1, 0.0 }
0x16a8   :  { %1048 = vst [vmem:[%s1575_s3] sm:$0xff] %v1047_v5 }

</bundles_post_ra>
